<compile_context>
chip_gen: v6e
topology: v6e:2x2x1
jax: 0.10.0
libtpu: 0.0.40
codegen_flags: <defaults>
</compile_context>

<pallas_src>
import functools
import math

import jax
import jax.numpy as jnp
from jax.experimental import pallas as pl
from jax.experimental.pallas import tpu as pltpu


def _attention_pointer_kernel(xp_ref, q_ref, wx_ref, bx_ref, v_ref,
                              e_ref, u_ref, *, use_tanh, C, reps):
    """One block of lane-packed rows (rows ordered node-major, batch-minor).

    xp_ref : (Rt, L)    L = pack*H; `pack` consecutive x rows packed along lanes
    q_ref  : (P, L)     resident q pattern; P = lcm(B, pack)/pack packed rows per period
    wx_ref : (L, L)     block-diagonal W_x^T (pack copies of the (H,H) block)
    bx_ref : (1, L)     b_x tiled pack times
    v_ref  : (L, pack)  block-diagonal v column (one output column per packed sub-row)
    e_ref  : (Rt, L)    packed e output (lane-dense store)
    u_ref  : (Rt, pack) packed logits output, float32
    """
    xp = xp_ref[...]                                                    # (Rt, L)

    # Conv1d(k=1) over the hidden channel for all `pack` sub-rows at once:
    # a single lane-dense, 128-deep MXU matmul against the block-diagonal weight.
    e = jnp.dot(xp, wx_ref[...], preferred_element_type=jnp.float32) + bx_ref[...]

    qp = q_ref[...]                                                     # (P, L)
    if reps > 1 and q_ref.shape[0] > 1:
        # General B: the batch pattern repeats every P packed rows inside the block.
        qp = jnp.tile(qp, (reps, 1))                                    # (Rt, L)
    # else: (1, L) pattern broadcasts over sublanes for free in the add below.

    t = jnp.tanh(e + qp)                                                # (Rt, L) VPU + EUP

    # v-reduction on the MXU (free slot); block-diagonal v yields one logit per sub-row.
    u = jnp.dot(t, v_ref[...], preferred_element_type=jnp.float32)      # (Rt, pack)
    if use_tanh:
        u = C * jnp.tanh(u)

    e_ref[...] = e.astype(e_ref.dtype)
    u_ref[...] = u


def attention_pointer(hidden, x, params, *, use_tanh=False, C=10.0):
    """hidden: (B, H), x: (N, B, H). Returns (e: (B, H, N), logits: (B, N))."""
    N, B, H = x.shape
    assert hidden.shape == (B, H)
    dtype = x.dtype
    itemsize = jnp.dtype(dtype).itemsize
    rows = N * B

    # Lane packing factor: pack consecutive flattened rows side by side on the 128 lanes.
    pack = 128 // H if (H <= 128 and 128 % H == 0) else 1
    L = pack * H

    # Rows are batch-minor: row r belongs to batch r % B, so q repeats with period
    # lcm(B, pack) original rows == P packed rows.
    period = (B * pack) // math.gcd(B, pack)
    P = period // pack

    # Pad rows to a multiple of `period` so every packed tile starts period-aligned
    # (padded rows are zeros; their outputs are sliced off below).
    rows_padded = ((rows + period - 1) // period) * period
    x2 = x.reshape(rows, H)                       # leading-dim merge only, no transpose
    if rows_padded != rows:
        x2 = jnp.pad(x2, ((0, rows_padded - rows), (0, 0)))
    packed_rows = rows_padded // pack
    xp = x2.reshape(packed_rows, L)               # contiguous reshape, free

    # Hoist q = Linear(hidden) into XLA: one tiny (B,H)@(H,H) matmul instead of per-step.
    q = (hidden.astype(jnp.float32) @ params["w_hidden"].astype(jnp.float32).T
         + params["b_hidden"].astype(jnp.float32))                      # (B, H) f32
    q_pat = q[jnp.arange(period) % B].reshape(P, L)                     # (P, L) resident

    # Block-diagonal packed weights (tiny, built once).
    eye = jnp.eye(pack, dtype=jnp.float32)
    wxT = params["w_x"].astype(jnp.float32).T                           # (H, H) (in, out)
    wx_blk = jnp.kron(eye, wxT)                                         # (L, L)
    bx_t = jnp.tile(params["b_x"].astype(jnp.float32), pack).reshape(1, L)
    v_blk = jnp.kron(eye, params["v"].astype(jnp.float32).reshape(H, 1))  # (L, pack)

    # Row-tile: multiple of lcm(P, 8) (pattern invariance + sublane alignment), ~6 MiB
    # per buffered operand (double-buffered x + e stays inside v7x's 64 MiB VMEM), and
    # split into >= 2 blocks when possible so v7x's second TensorCore gets work.
    unit = (P * 8) // math.gcd(P, 8)
    budget_bytes = 6 * 1024 * 1024
    max_rt = max(unit, (budget_bytes // max(1, L * itemsize)) // unit * unit)
    if packed_rows <= unit:
        rt_p = packed_rows                        # single small block (test shapes)
    else:
        half = -(-packed_rows // 2)
        rt_p = min(max_rt, -(-half // unit) * unit)
    n_blocks = pl.cdiv(packed_rows, rt_p)
    reps = rt_p // P

    kernel = functools.partial(_attention_pointer_kernel,
                               use_tanh=use_tanh, C=float(C), reps=reps)

    e_p, u_p = pl.pallas_call(
        kernel,
        out_shape=(
            jax.ShapeDtypeStruct((packed_rows, L), dtype),
            jax.ShapeDtypeStruct((packed_rows, pack), jnp.float32),
        ),
        grid_spec=pltpu.PrefetchScalarGridSpec(
            num_scalar_prefetch=0,
            grid=(n_blocks,),
            in_specs=[
                pl.BlockSpec((rt_p, L), lambda i: (i, 0)),      # packed x row block
                pl.BlockSpec((P, L), lambda i: (0, 0)),         # q pattern (resident)
                pl.BlockSpec((L, L), lambda i: (0, 0)),         # block-diag W_x^T (resident)
                pl.BlockSpec((1, L), lambda i: (0, 0)),         # tiled b_x (resident)
                pl.BlockSpec((L, pack), lambda i: (0, 0)),      # block-diag v (resident)
            ],
            out_specs=[
                pl.BlockSpec((rt_p, L), lambda i: (i, 0)),      # packed e rows (lane-dense)
                pl.BlockSpec((rt_p, pack), lambda i: (i, 0)),   # packed logits rows (f32)
            ],
        ),
        compiler_params=pltpu.CompilerParams(
            dimension_semantics=("parallel",),                  # independent row blocks
            vmem_limit_bytes=48 * 1024 * 1024,                  # v7x-safe (64 MiB physical)
        ),
    )(xp, q_pat, wx_blk, bx_t, v_blk)

    # Unpack lanes back to flattened rows (contiguous reshapes), drop padding.
    e_rows = e_p.reshape(rows_padded, H)[:rows]
    u_rows = u_p.reshape(rows_padded)[:rows]

    # Rows (node-major, batch-minor) -> PyTorch layouts. The e transpose is required only
    # for (B,H,N) parity; consumers that accept the (N,B,H)/flattened layout should use
    # e_rows directly to avoid re-streaming e through HBM.
    e = jnp.transpose(e_rows.reshape(N, B, H), (1, 2, 0))               # (B, H, N)
    logits = jnp.transpose(u_rows.reshape(N, B), (1, 0)).astype(dtype)  # (B, N)
    return e, logits


def attention_pointer_ref(hidden, x, params, *, use_tanh=False, C=10.0):
    """Pure-JAX reference mirroring the PyTorch forward exactly."""
    x_p = jnp.transpose(x, (1, 2, 0))                                   # (B, H, N)
    q = hidden @ params["w_hidden"].T + params["b_hidden"]              # (B, H)
    e = jnp.einsum("oi,bin->bon", params["w_x"], x_p) + params["b_x"][None, :, None]
    t = jnp.tanh(q[:, :, None] + e)                                     # (B, H, N)
    u = jnp.einsum("h,bhn->bn", params["v"], t)                         # (B, N)
    logits = C * jnp.tanh(u) if use_tanh else u
    return e, logits


def init_params(key, hidden_dim, dtype=jnp.float32):
    bound = 1.0 / math.sqrt(hidden_dim)
    ks = jax.random.split(key, 5)
    return {
        # nn.Linear(hidden_dim, hidden_dim): weight (out, in), bias (out,)
        "w_hidden": jax.random.uniform(ks[0], (hidden_dim, hidden_dim), dtype, -bound, bound),
        "b_hidden": jax.random.uniform(ks[1], (hidden_dim,), dtype, -bound, bound),
        # nn.Conv1d(hidden_dim, hidden_dim, 1): weight (out, in, 1) squeezed -> (out, in)
        "w_x": jax.random.uniform(ks[2], (hidden_dim, hidden_dim), dtype, -bound, bound),
        "b_x": jax.random.uniform(ks[3], (hidden_dim,), dtype, -bound, bound),
        # self.v ~ U(-1/sqrt(H), 1/sqrt(H))
        "v": jax.random.uniform(ks[4], (hidden_dim,), dtype, -bound, bound),
    }


if __name__ == "__main__":
    B, N, H = 2, 8, 32   # batch, node_num, hidden_dim

    key = jax.random.PRNGKey(0)
    k_param, k_hidden, k_x = jax.random.split(key, 3)

    params = init_params(k_param, H)
    hidden = jax.random.normal(k_hidden, (B, H), jnp.float32)
    x = jax.random.normal(k_x, (N, B, H), jnp.float32)

    e, logits = attention_pointer(hidden, x, params, use_tanh=False)
    e = jax.block_until_ready(e)
    logits = jax.block_until_ready(logits)

    e_ref, logits_ref = attention_pointer_ref(hidden, x, params, use_tanh=False)

    assert e.shape == (B, H, N) and logits.shape == (B, N)
    assert jnp.allclose(e, e_ref, atol=2e-5, rtol=2e-5)
    assert jnp.allclose(logits, logits_ref, atol=3e-5, rtol=3e-5)

    # Also exercise the use_tanh=True branch.
    e2, logits2 = attention_pointer(hidden, x, params, use_tanh=True)
    jax.block_until_ready(logits2)
    _, logits2_ref = attention_pointer_ref(hidden, x, params, use_tanh=True)
    assert jnp.allclose(logits2, logits2_ref, atol=3e-5, rtol=3e-5)

    print("KERNEL_OK")
</pallas_src>

<mosaic_0001>
module attributes {stable_mosaic.version = 11 : i64} {
  func.func @_attention_pointer_kernel(%arg0: i32, %arg1: memref<4x128xf32, #tpu.memory_space<vmem>>, %arg2: memref<1x128xf32, #tpu.memory_space<vmem>>, %arg3: memref<128x128xf32, #tpu.memory_space<vmem>>, %arg4: memref<1x128xf32, #tpu.memory_space<vmem>>, %arg5: memref<128x4xf32, #tpu.memory_space<vmem>>, %arg6: memref<4x128xf32, #tpu.memory_space<vmem>>, %arg7: memref<4x4xf32, #tpu.memory_space<vmem>>) attributes {dimension_semantics = [#tpu.dimension_semantics<parallel>], iteration_bounds = array<i64: 1>, scalar_prefetch = 0 : i64, scratch_operands = 0 : i64, tpu.core_type = #tpu.core_type<tc>, window_params = [{transform_indices = @transform_0, window_bounds = array<i64: 4, 128>}, {pipeline_mode = #tpu.pipeline_mode<synchronous>, transform_indices = @transform_1, window_bounds = array<i64: 1, 128>}, {pipeline_mode = #tpu.pipeline_mode<synchronous>, transform_indices = @transform_2, window_bounds = array<i64: 128, 128>}, {pipeline_mode = #tpu.pipeline_mode<synchronous>, transform_indices = @transform_3, window_bounds = array<i64: 1, 128>}, {pipeline_mode = #tpu.pipeline_mode<synchronous>, transform_indices = @transform_4, window_bounds = array<i64: 128, 4>}, {transform_indices = @transform_5, window_bounds = array<i64: 4, 128>}, {transform_indices = @transform_6, window_bounds = array<i64: 4, 4>}]} {
    %c0 = arith.constant 0 : index
    %c0_0 = arith.constant 0 : index
    %0 = vector.load %arg1[%c0, %c0_0] : memref<4x128xf32, #tpu.memory_space<vmem>>, vector<4x128xf32>
    %c0_1 = arith.constant 0 : index
    %c0_2 = arith.constant 0 : index
    %1 = vector.load %arg3[%c0_1, %c0_2] : memref<128x128xf32, #tpu.memory_space<vmem>>, vector<128x128xf32>
    %cst = arith.constant dense<0.000000e+00> : vector<4x128xf32>
    %2 = tpu.matmul %0, %1, %cst {dimension_numbers = #tpu.dot_dimension_numbers<[1], [0], [0], [1], [0, 0, 1, 1], [], []>} : vector<4x128xf32>, vector<128x128xf32>, vector<4x128xf32> -> vector<4x128xf32>
    %c0_3 = arith.constant 0 : index
    %c0_4 = arith.constant 0 : index
    %3 = vector.load %arg4[%c0_3, %c0_4] : memref<1x128xf32, #tpu.memory_space<vmem>>, vector<1x128xf32>
    %4 = vector.broadcast %3 : vector<1x128xf32> to vector<4x128xf32>
    %5 = arith.addf %2, %4 : vector<4x128xf32>
    %c0_5 = arith.constant 0 : index
    %c0_6 = arith.constant 0 : index
    %6 = vector.load %arg2[%c0_5, %c0_6] : memref<1x128xf32, #tpu.memory_space<vmem>>, vector<1x128xf32>
    %7 = vector.broadcast %6 : vector<1x128xf32> to vector<4x128xf32>
    %8 = arith.addf %5, %7 : vector<4x128xf32>
    %9 = math.tanh %8 : vector<4x128xf32>
    %c0_7 = arith.constant 0 : index
    %c0_8 = arith.constant 0 : index
    %10 = vector.load %arg5[%c0_7, %c0_8] : memref<128x4xf32, #tpu.memory_space<vmem>>, vector<128x4xf32>
    %cst_9 = arith.constant dense<0.000000e+00> : vector<4x4xf32>
    %11 = tpu.matmul %9, %10, %cst_9 {dimension_numbers = #tpu.dot_dimension_numbers<[1], [0], [0], [1], [0, 0, 1, 1], [], []>} : vector<4x128xf32>, vector<128x4xf32>, vector<4x4xf32> -> vector<4x4xf32>
    %c0_10 = arith.constant 0 : index
    %c0_11 = arith.constant 0 : index
    %12 = vector.load %arg6[%c0_10, %c0_11] : memref<4x128xf32, #tpu.memory_space<vmem>>, vector<4x128xf32>
    tpu.vector_store %arg6[%c0_10, %c0_11], %5 {strides = array<i32>} : memref<4x128xf32, #tpu.memory_space<vmem>>, vector<4x128xf32>,
    %c0_12 = arith.constant 0 : index
    %c0_13 = arith.constant 0 : index
    %13 = vector.load %arg7[%c0_12, %c0_13] : memref<4x4xf32, #tpu.memory_space<vmem>>, vector<4x4xf32>
    tpu.vector_store %arg7[%c0_12, %c0_13], %11 {strides = array<i32>} : memref<4x4xf32, #tpu.memory_space<vmem>>, vector<4x4xf32>,
    return
  }
  func.func @transform_0(%arg0: i32) -> (i32, i32) {
    %c0_i32 = arith.constant 0 : i32
    %c0_i32_0 = arith.constant 0 : i32
    return %arg0, %c0_i32 : i32, i32
  }
  func.func @transform_1(%arg0: i32) -> (i32, i32) {
    %c0_i32 = arith.constant 0 : i32
    %c0_i32_0 = arith.constant 0 : i32
    %c0_i32_1 = arith.constant 0 : i32
    return %c0_i32, %c0_i32_0 : i32, i32
  }
  func.func @transform_2(%arg0: i32) -> (i32, i32) {
    %c0_i32 = arith.constant 0 : i32
    %c0_i32_0 = arith.constant 0 : i32
    %c0_i32_1 = arith.constant 0 : i32
    return %c0_i32, %c0_i32_0 : i32, i32
  }
  func.func @transform_3(%arg0: i32) -> (i32, i32) {
    %c0_i32 = arith.constant 0 : i32
    %c0_i32_0 = arith.constant 0 : i32
    %c0_i32_1 = arith.constant 0 : i32
    return %c0_i32, %c0_i32_0 : i32, i32
  }
  func.func @transform_4(%arg0: i32) -> (i32, i32) {
    %c0_i32 = arith.constant 0 : i32
    %c0_i32_0 = arith.constant 0 : i32
    %c0_i32_1 = arith.constant 0 : i32
    return %c0_i32, %c0_i32_0 : i32, i32
  }
  func.func @transform_5(%arg0: i32) -> (i32, i32) {
    %c0_i32 = arith.constant 0 : i32
    %c0_i32_0 = arith.constant 0 : i32
    return %arg0, %c0_i32 : i32, i32
  }
  func.func @transform_6(%arg0: i32) -> (i32, i32) {
    %c0_i32 = arith.constant 0 : i32
    %c0_i32_0 = arith.constant 0 : i32
    return %arg0, %c0_i32 : i32, i32
  }
}

</mosaic_0001>

<bundles_post_ra>
// kernel: tpu_custom_call.1
= control target key start
LH: loop header
LB: loop body
LE: loop exit
PB: predicated region body
PF: predicated region fallthrough
CT: control target
= control target key end

     0   :  { %12 = vsyncpa [#allocation3], 0  ;;  %v400_v1 = vmov 0.0   ;;  %vm401_vm0 = vmmov 0   ;;  %s584_s0 = inlined_call_operand.vmem [shape: f32[4,128], index: 0, kind: input, shape index: {}]   ;;  %s585_s1 = inlined_call_operand.vmem [shape: f32[1,128], index: 1, kind: input, shape index: {}]   ;;  %s586_s2 = inlined_call_operand.vmem [shape: f32[128,128], index: 2, kind: input, shape index: {}]   ;;  %s587_s3 = inlined_call_operand.vmem [shape: f32[1,128], index: 3, kind: input, shape index: {}]   ;;  %s588_s4 = inlined_call_operand.vmem [shape: f32[128,4], index: 4, kind: input, shape index: {}]   ;;  %s589_s5 = inlined_call_operand.hbm [shape: f32[4,128], index: 5, kind: output, shape index: {0}]   ;;  %s590_s6 = inlined_call_operand.hbm [shape: f32[4,4], index: 6, kind: output, shape index: {1}]  }
   0x1   :  { %v40_v0 = vld [vmem:[%s586_s2 + $0x78] sm:$0xff]  ;;  %280 = vmatprep.subr.mxu0 %v400_v1  ;;  %v39_v2 = vld [vmem:[%s586_s2 + $0x70] sm:$0xff]  ;;  %312 = vmatprep.mubr.msk.f32.mxu0 %vm401_vm0, %v400_v1  ;;  %v38_v3 = vld [vmem:[%s586_s2 + $0x68] sm:$0xff] }
   0x2   :  { %281 = vmatpush3.msra.mxu0 %v40_v0  ;;  %315 = vmatprep.subr.mxu1 %v400_v1  ;;  %v37_v4 = vld [vmem:[%s586_s2 + $0x60] sm:$0xff]  ;;  %v142_v5 = vld [vmem:[%s588_s4 + $0x78] sm:$0xff]  ;;  %v141_v6 = vld [vmem:[%s588_s4 + $0x70] sm:$0xff] }
   0x3   :  { %282 = vmatprep.subr.mxu0 %v400_v1  ;;  %347 = vmatprep.mubr.msk.f32.mxu1 %vm401_vm0, %v400_v1  ;;  %v36_v7 = vld [vmem:[%s586_s2 + $0x58] sm:$0xff]  ;;  %v140_v8 = vld [vmem:[%s588_s4 + $0x68] sm:$0xff] }
   0x4   :  { %283 = vmatpush3.msra.mxu0 %v39_v2  ;;  %316 = vmatpush3.msra.mxu1 %v142_v5 }
   0x5   :  { %284 = vmatprep.subr.mxu0 %v400_v1  ;;  %317 = vmatprep.subr.mxu1 %v400_v1 }
   0x6   :  { %285 = vmatpush3.msra.mxu0 %v38_v3  ;;  %318 = vmatpush3.msra.mxu1 %v141_v6 }
   0x7   :  { %286 = vmatprep.subr.mxu0 %v400_v1 }
   0x8   :  { %287 = vmatpush3.msra.mxu0 %v37_v4 }
   0x9   :  { %13 = vsyncpa [#allocation5], 0  ;;  %288 = vmatprep.subr.mxu0 %v400_v1  ;;  %v35_v9 = vld [vmem:[%s586_s2 + $0x50] sm:$0xff]  ;;  %319 = vmatprep.subr.mxu1 %v400_v1  ;;  %v139_v10 = vld [vmem:[%s588_s4 + $0x60] sm:$0xff] }
   0xa   :  { %289 = vmatpush3.msra.mxu0 %v36_v7  ;;  %320 = vmatpush3.msra.mxu1 %v140_v8  ;;  %v34_v11 = vld [vmem:[%s586_s2 + $0x48] sm:$0xff]  ;;  %v138_v12 = vld [vmem:[%s588_s4 + $0x58] sm:$0xff]  ;;  %v33_v13 = vld [vmem:[%s586_s2 + $0x40] sm:$0xff] }
   0xb   :  { %290 = vmatprep.subr.mxu0 %v400_v1  ;;  %321 = vmatprep.subr.mxu1 %v400_v1  ;;  %v137_v14 = vld [vmem:[%s588_s4 + $0x50] sm:$0xff]  ;;  %v32_v15 = vld [vmem:[%s586_s2 + $0x38] sm:$0xff]  ;;  %v30_v17 = vld [vmem:[%s586_s2 + $0x28] sm:$0xff] }
   0xc   :  { %291 = vmatpush3.msra.mxu0 %v35_v9  ;;  %322 = vmatpush3.msra.mxu1 %v139_v10  ;;  %v31_v16 = vld [vmem:[%s586_s2 + $0x30] sm:$0xff]  ;;  %v29_v18 = vld [vmem:[%s586_s2 + $0x20] sm:$0xff]  ;;  %v28_v19 = vld [vmem:[%s586_s2 + $0x18] sm:$0xff] }
   0xd   :  { %292 = vmatprep.subr.mxu0 %v400_v1  ;;  %323 = vmatprep.subr.mxu1 %v400_v1  ;;  %v27_v20 = vld [vmem:[%s586_s2 + $0x10] sm:$0xff]  ;;  %v26_v21 = vld [vmem:[%s586_s2 + $0x8] sm:$0xff]  ;;  %v25_v22 = vld [vmem:[%s586_s2] sm:$0xff] }
   0xe   :  { %293 = vmatpush3.msra.mxu0 %v34_v11  ;;  %324 = vmatpush3.msra.mxu1 %v138_v12  ;;  %v24_v23 = vld [vmem:[%s584_s0] sm:$0xf]  ;;  %v136_v24 = vld [vmem:[%s588_s4 + $0x48] sm:$0xff]  ;;  %v134_v26 = vld [vmem:[%s588_s4 + $0x38] sm:$0xff] }
   0xf   :  { %294 = vmatprep.subr.mxu0 %v400_v1  ;;  %325 = vmatprep.subr.mxu1 %v400_v1  ;;  %v135_v25 = vld [vmem:[%s588_s4 + $0x40] sm:$0xff]  ;;  %v133_v27 = vld [vmem:[%s588_s4 + $0x30] sm:$0xff]  ;;  %v132_v28 = vld [vmem:[%s588_s4 + $0x28] sm:$0xff] }
  0x10   :  { %295 = vmatpush3.msra.mxu0 %v33_v13  ;;  %326 = vmatpush3.msra.mxu1 %v137_v14  ;;  %v131_v29 = vld [vmem:[%s588_s4 + $0x20] sm:$0xff]  ;;  %v130_v30 = vld [vmem:[%s588_s4 + $0x18] sm:$0xff]  ;;  %v129_v31 = vld [vmem:[%s588_s4 + $0x10] sm:$0xff] }
  0x11   :  { %296 = vmatprep.subr.mxu0 %v400_v1  ;;  %327 = vmatprep.subr.mxu1 %v400_v1  ;;  %v128_v32 = vld [vmem:[%s588_s4 + $0x8] sm:$0xff]  ;;  %v127_v33 = vld [vmem:[%s588_s4] sm:$0xff]  ;;  %s402_s4 = smov [#allocation2]  }
  0x12   :  { %297 = vmatpush3.msra.mxu0 %v32_v15  ;;  %328 = vmatpush3.msra.mxu1 %v136_v24  ;;  %v244_v34 = vld [vmem:[%s587_s3] ss:$0 sm:$0xff]  ;;  %s222_s17 = sshll.u32 %s402_s4, 4  ;;  %s223_s17 = int_to_ptr.vmem [resolvable:$true] %s222_s17 }
  0x13   :  { %298 = vmatprep.subr.mxu0 %v400_v1  ;;  %329 = vmatprep.subr.mxu1 %v400_v1  ;;  %v245_v36 = vld [vmem:[%s585_s1] ss:$0 sm:$0xff]  ;;  %s356_s18 = scalar_lea.vmem %s223_s17, 64  ;;  %p361_p1 = scmp.lt.s32.totalorder %s223_s17, %s223_s17 }
  0x14   :  { %299 = vmatpush3.msra.mxu0 %v31_v16  ;;  %330 = vmatpush3.msra.mxu1 %v135_v25  ;;  %p357_p0 = scmp.ne.s32.totalorder %s223_s17, %s356_s18  ;;  %p362_p2 = scmp.lt.s32.totalorder %s356_s18, %s356_s18 }
  0x15   :  { %300 = vmatprep.subr.mxu0 %v400_v1  ;;  %331 = vmatprep.subr.mxu1 %v400_v1 }
  0x16   :  { %301 = vmatpush3.msra.mxu0 %v30_v17  ;;  %332 = vmatpush3.msra.mxu1 %v134_v26  ;;  %p363_p3 = por %p362_p2, %p361_p1 }
  0x17   :  { %302 = vmatprep.subr.mxu0 %v400_v1  ;;  %333 = vmatprep.subr.mxu1 %v400_v1 }
  0x18   :  { %303 = vmatpush3.msra.mxu0 %v29_v18  ;;  %334 = vmatpush3.msra.mxu1 %v133_v27  ;;  %p364_p4 = pnand %p363_p3, %p357_p0 }
  0x19   :  { %304 = vmatprep.subr.mxu0 %v400_v1  ;;  %335 = vmatprep.subr.mxu1 %v400_v1 }
  0x1a   :  { %305 = vmatpush3.msra.mxu0 %v28_v19  ;;  %336 = vmatpush3.msra.mxu1 %v132_v28 }
  0x1b   :  { %306 = vmatprep.subr.mxu0 %v400_v1  ;;  %337 = vmatprep.subr.mxu1 %v400_v1 }
  0x1c   :  { %307 = vmatpush3.msra.mxu0 %v27_v20  ;;  %338 = vmatpush3.msra.mxu1 %v131_v29 }
  0x1d   :  { %308 = vmatprep.subr.mxu0 %v400_v1  ;;  %339 = vmatprep.subr.mxu1 %v400_v1 }
  0x1e   :  { %309 = vmatpush3.msra.mxu0 %v26_v21  ;;  %340 = vmatpush3.msra.mxu1 %v130_v30 }
  0x1f   :  { %310 = vmatprep.subr.mxu0 %v400_v1  ;;  %341 = vmatprep.subr.mxu1 %v400_v1 }
  0x20   :  { %311 = vmatpush3.msra.mxu0 %v25_v22  ;;  %342 = vmatpush3.msra.mxu1 %v129_v31 }
  0x21   :  { %313 = vmatmul.mubr.f32.vlgmr.msra.gmra.mxu0 %v24_v23  ;;  %343 = vmatprep.subr.mxu1 %v400_v1 }
  0x22   :  { %344 = vmatpush3.msra.mxu1 %v128_v32 }
  0x23   :  { %345 = vmatprep.subr.mxu1 %v400_v1 }
  0x24   :  { %346 = vmatpush3.msra.mxu1 %v127_v33 }
  0xe1   :  { %v114_v35 = vpop.f32.mrf.mxu0 }
  0xe2   :  { %v115_v37 = vadd.f32 %v244_v34, %v114_v35 }
  0xe3   :  { %v314_v38 = vpop.f32.mrf.mxu0 }
  0xe4   :  { %v125_v39 = vadd.f32 %v245_v36, %v115_v37  ;;  %213 = vst [vmem:[#allocation2] sm:$0xf] %v115_v37 }
  0xe6   :  { %354 = vtanh.f32 %v125_v39 }
  0xf3   :  { %v355_v40 = vpop.eup %354 }
  0xf4   :  { %348 = vmatmul.mubr.f32.vlgmr.msra.gmra.mxu1 %v355_v40 }
  0xf5   :  { %367 = shalt.err (!%p364_p4)
}
  0xf6   :  { %225 = dma.vmem_to_hbm [thread:$0]  %s223_s17, 64, %s589_s5, [#allocation3]   ;;  %vm214_vm1 = vcmask 27648  }
  0xf7   :  { %s403_s1 = smov [#allocation4]  }
  0xf8   :  { %s232_s20 = sshll.u32 %s403_s1, 4  ;;  %s233_s20 = int_to_ptr.vmem [resolvable:$true] %s232_s20 }
  0xf9   :  { %s376_s21 = scalar_lea.vmem %s233_s20, 64  ;;  %p381_p6 = scmp.lt.s32.totalorder %s233_s20, %s233_s20 }
  0xfa   :  { %p377_p5 = scmp.ne.s32.totalorder %s233_s20, %s376_s21  ;;  %p382_p7 = scmp.lt.s32.totalorder %s376_s21, %s376_s21 }
  0xfc   :  { %p383_p8 = por %p382_p7, %p381_p6 }
  0xfe   :  { %p384_p9 = pnand %p383_p8, %p377_p5 }
 0x1b4   :  { %v209_v41 = vpop.f32.mrf.mxu1 }
 0x1b5   :  { %215 = vst.msk [vmem:[#allocation4] sm:$0xf] %vm214_vm1, %v209_v41 }
 0x1b6   :  { %v349_v42 = vpop.f32.mrf.mxu1 }
 0x1b7   :  { %387 = shalt.err (!%p384_p9)
}
 0x1b8   :  { %235 = dma.vmem_to_hbm [thread:$0]  %s233_s20, 64, %s590_s6, [#allocation5]  }
 0x1b9   :  { %396 = dma.done.wait [#allocation3], 64  }
 0x1ba   :  { %397 = vsyncadd [#allocation3], 4294967232 }
 0x1bb   :  { %398 = dma.done.wait [#allocation5], 64  }
 0x1bc   :  { %399 = vsyncadd [#allocation5], 4294967232 }
 0x1bd   :  { %242 = vsyncpa [#allocation3], 1 }
 0x1be   :  { %243 = vsyncpa [#allocation5], 1 }

</bundles_post_ra>
